<compile_context>
chip_gen: v6e
topology: v6e:2x2x1
jax: 0.10.0
libtpu: 0.0.40
codegen_flags: <defaults>
</compile_context>

<pallas_src>
import functools
import math

import jax
import jax.numpy as jnp
from jax.experimental import pallas as pl
from jax.experimental.pallas import tpu as pltpu


# ----------------------------------------------------------------------------
# Kernels
# ----------------------------------------------------------------------------
def _softmax_lastdim_kernel(x_ref, o_ref):
    # x_ref/o_ref: (TM, N) tile in VMEM; numerically-stable softmax along lanes.
    x = x_ref[...].astype(jnp.float32)
    m = jnp.max(x, axis=-1, keepdims=True)
    e = jnp.exp(x - m)
    s = jnp.sum(e, axis=-1, keepdims=True)
    # Exact reciprocal keeps the 1e-6 tolerance; softmax is HBM-bound so the
    # EUP/VALU cost is hidden under DMA anyway (per perf review: no micro-opts).
    o_ref[...] = (e * pl.reciprocal(s, approx=False)).astype(o_ref.dtype)


def _softmax_sublane_kernel(x_ref, o_ref):
    # x_ref/o_ref: (TB, R, TL) tile in VMEM.  The softmax (reduction) axis R
    # sits on sublanes; the lane axis carries TL spatial elements, so loads and
    # stores are lane-dense and no transpose is ever needed.
    x = x_ref[...].astype(jnp.float32)
    m = jnp.max(x, axis=-2, keepdims=True)
    e = jnp.exp(x - m)
    s = jnp.sum(e, axis=-2, keepdims=True)
    o_ref[...] = (e * pl.reciprocal(s, approx=False)).astype(o_ref.dtype)


# ----------------------------------------------------------------------------
# Tiling / budgeting helpers
# ----------------------------------------------------------------------------
_TILE_BYTES = 2 * 1024 * 1024          # target native-dtype DMA tile size
_MEGACORE_MIN_BYTES = 4 * 1024 * 1024  # only force >=2 grid steps above this
_DEFAULT_VMEM = 128 * 1024 * 1024


def _sublane_gran(dtype):
    # Packed-sublane granularity: 8 rows for 4-byte, 16 for bf16, 32 for int8.
    return {4: 8, 2: 16, 1: 32}.get(jnp.dtype(dtype).itemsize, 8)


def _round_up(x, m):
    return -(-x // m) * m


def _vmem_capacity():
    try:
        return int(pltpu.get_tpu_info().vmem_capacity_bytes)
    except Exception:  # pragma: no cover - conservative fallback
        return _DEFAULT_VMEM


def _vmem_cap():
    # <= ~96 MiB on v5e/v6e (128 MiB physical), <= ~48 MiB on v7x (64 MiB).
    return (3 * _vmem_capacity()) // 4


def _block_need_bytes(block_padded_elems, itemsize, single_buffered):
    # in + out tiles at native dtype (double- or single-buffered) plus ~3
    # f32-tile compute temporaries plus slack for Mosaic internals.
    bufs = 1 if single_buffered else 2
    return (2 * bufs * block_padded_elems * itemsize
            + 3 * block_padded_elems * 4
            + (4 << 20))


def _vmem_limit(block_padded_elems, itemsize, single_buffered):
    need = _block_need_bytes(block_padded_elems, itemsize, single_buffered)
    return int(min(_vmem_cap(), max(need, 16 << 20)))


def _cost(total_elems, itemsize):
    # Advisory hint: softmax is HBM-bound (read + write once) with one exp/elem.
    return pl.CostEstimate(
        flops=5 * total_elems,
        transcendentals=total_elems,
        bytes_accessed=2 * total_elems * itemsize,
    )


# ----------------------------------------------------------------------------
# pallas_call wrappers
# ----------------------------------------------------------------------------
def _softmax_last_axis(x2d):
    rows, n = x2d.shape
    itemsize = jnp.dtype(x2d.dtype).itemsize
    gran = _sublane_gran(x2d.dtype)
    n_pad = _round_up(n, 128)                     # lane padding of each row
    total_bytes = rows * n * itemsize

    # Row tile: budget the native-dtype DMA tile (f32 temps are accounted for
    # in the VMEM limit), rounded down to the packed-sublane granularity.
    tm = (_TILE_BYTES // max(n_pad * itemsize, 1)) // gran * gran
    tm = max(tm, gran)
    if tm >= rows:
        tm = rows                                 # full-extent block (legal)

    # Keep >=2 grid steps on non-trivial sizes so both v7x TensorCores get
    # work (harmless elsewhere: each block stays >~1 MiB).
    if (total_bytes > _MEGACORE_MIN_BYTES and rows >= 2 * gran
            and math.ceil(rows / tm) < 2):
        tm = _round_up(math.ceil(rows / 2), gran)

    tm_pad = min(_round_up(tm, gran), _round_up(rows, gran))
    block_padded_elems = tm_pad * n_pad

    # Robustness for vocab-sized N where even a gran-row tile is huge: drop to
    # single buffering rather than overflowing the VMEM cap.
    single = _block_need_bytes(block_padded_elems, itemsize, False) > _vmem_cap()
    # TODO(synk): online (flash-style) softmax over a reduction grid axis for N
    # so large that even a single-buffered minimum tile exceeds physical VMEM.
    # TODO(synk): pack G=128//N rows per lane group when N<128 is a hot shape
    # so stores are lane-dense instead of masked.
    spec_kwargs = {"pipeline_mode": pl.Buffered(1)} if single else {}

    grid = (pl.cdiv(rows, tm),)
    return pl.pallas_call(
        _softmax_lastdim_kernel,
        out_shape=jax.ShapeDtypeStruct((rows, n), x2d.dtype),
        grid_spec=pltpu.PrefetchScalarGridSpec(
            num_scalar_prefetch=0,
            grid=grid,
            in_specs=[pl.BlockSpec((tm, n), lambda i: (i, 0), **spec_kwargs)],
            out_specs=pl.BlockSpec((tm, n), lambda i: (i, 0), **spec_kwargs),
        ),
        compiler_params=pltpu.CompilerParams(
            dimension_semantics=("parallel",),
            vmem_limit_bytes=_vmem_limit(block_padded_elems, itemsize, single),
        ),
        cost_estimate=_cost(rows * n, itemsize),
    )(x2d)


def _softmax_inner_axis(x3d):
    b, r, l = x3d.shape
    itemsize = jnp.dtype(x3d.dtype).itemsize
    gran = _sublane_gran(x3d.dtype)
    r_pad = _round_up(r, gran)                    # sublane padding per b-slab
    total_bytes = b * r * l * itemsize

    # Lane tile: multiple of 128 (or full lane extent), budgeted with the
    # sublane-PADDED R for one b-slab at the native itemsize.
    tl = (_TILE_BYTES // max(r_pad * itemsize, 1)) // 128 * 128
    tl = max(tl, 128)
    if tl >= l:
        tl = l
    tl_pad = min(_round_up(tl, 128), _round_up(l, 128))

    # Batch the leading dim into the block so NCHW-style tiles are MiB-sized
    # (the single biggest lever per the perf review), padding-aware.
    tb = max(1, _TILE_BYTES // max(r_pad * tl_pad * itemsize, 1))
    tb = min(tb, b)

    # Keep >=2 grid steps on non-trivial sizes so both v7x TensorCores work.
    if (total_bytes > _MEGACORE_MIN_BYTES
            and math.ceil(b / tb) * math.ceil(l / tl) < 2):
        if b >= 2:
            tb = math.ceil(b / 2)
        elif l > 256:
            tl = max(128, _round_up(math.ceil(l / 2), 128))
            tl_pad = min(_round_up(tl, 128), _round_up(l, 128))

    block_padded_elems = tb * r_pad * tl_pad

    single = _block_need_bytes(block_padded_elems, itemsize, False) > _vmem_cap()
    # TODO(synk): online (flash-style) sublane softmax over a reduction grid
    # axis for R so large that even a single-buffered (1, R, 128) tile exceeds
    # physical VMEM.
    spec_kwargs = {"pipeline_mode": pl.Buffered(1)} if single else {}

    grid = (pl.cdiv(b, tb), pl.cdiv(l, tl))
    return pl.pallas_call(
        _softmax_sublane_kernel,
        out_shape=jax.ShapeDtypeStruct((b, r, l), x3d.dtype),
        grid_spec=pltpu.PrefetchScalarGridSpec(
            num_scalar_prefetch=0,
            grid=grid,
            in_specs=[pl.BlockSpec((tb, r, tl), lambda i, j: (i, 0, j), **spec_kwargs)],
            out_specs=pl.BlockSpec((tb, r, tl), lambda i, j: (i, 0, j), **spec_kwargs),
        ),
        compiler_params=pltpu.CompilerParams(
            dimension_semantics=("parallel", "parallel"),
            vmem_limit_bytes=_vmem_limit(block_padded_elems, itemsize, single),
        ),
        cost_estimate=_cost(b * r * l, itemsize),
    )(x3d)


# ----------------------------------------------------------------------------
# Public entry point (same semantics as F.softmax(x, dim=axis))
# ----------------------------------------------------------------------------
@functools.partial(jax.jit, static_argnames=("axis",))
def pallas_softmax(x, axis):
    ndim = x.ndim
    axis = axis % ndim
    shape = x.shape

    if axis == ndim - 1:
        # Reduce over the trailing dim: view-only reshape, no data movement.
        n = shape[-1]
        rows = math.prod(shape[:-1]) if ndim > 1 else 1
        out = _softmax_last_axis(x.reshape(rows, n))
        return out.reshape(shape)

    # Reduce over an inner axis: keep the original memory layout (no XLA
    # transposes).  Collapse leading dims -> B, keep the softmax axis -> R,
    # collapse trailing dims -> L (lane axis).
    b = math.prod(shape[:axis]) if axis > 0 else 1
    r = shape[axis]
    l = math.prod(shape[axis + 1:])
    out = _softmax_inner_axis(x.reshape(b, r, l))
    return out.reshape(shape)


if __name__ == "__main__":
    key = jax.random.PRNGKey(0)
    # Small NCHW-style input consistent with the module's forward.
    x = jax.random.normal(key, (2, 4, 16, 16), dtype=jnp.float32)
    axis = 1  # softmax over the channel dimension, like Model(axis=1)

    out = pallas_softmax(x, axis)
    out = jax.block_until_ready(out)

    ref = jax.nn.softmax(x, axis=axis)
    assert out.shape == x.shape and out.dtype == x.dtype
    assert jnp.allclose(out, ref, atol=1e-6, rtol=1e-6)

    # Also exercise the last-axis path once (cheap sanity check).
    x2 = jax.random.normal(jax.random.PRNGKey(1), (2, 8, 32), dtype=jnp.float32)
    out2 = jax.block_until_ready(pallas_softmax(x2, -1))
    assert jnp.allclose(out2, jax.nn.softmax(x2, axis=-1), atol=1e-6, rtol=1e-6)

    print("KERNEL_OK")
</pallas_src>

<mosaic_0001>
module attributes {stable_mosaic.version = 11 : i64} {
  func.func @_softmax_sublane_kernel(%arg0: i32, %arg1: i32, %arg2: memref<2x4x256xf32, #tpu.memory_space<vmem>>, %arg3: memref<2x4x256xf32, #tpu.memory_space<vmem>>) attributes {dimension_semantics = [#tpu.dimension_semantics<parallel>, #tpu.dimension_semantics<parallel>], iteration_bounds = array<i64: 1, 1>, scalar_prefetch = 0 : i64, scratch_operands = 0 : i64, tpu.core_type = #tpu.core_type<tc>, window_params = [{transform_indices = @transform_0, window_bounds = array<i64: 2, 4, 256>}, {transform_indices = @transform_1, window_bounds = array<i64: 2, 4, 256>}]} {
    %c0 = arith.constant 0 : index
    %c0_0 = arith.constant 0 : index
    %c0_1 = arith.constant 0 : index
    %0 = vector.load %arg2[%c0, %c0_0, %c0_1] : memref<2x4x256xf32, #tpu.memory_space<vmem>>, vector<2x4x256xf32>
    %cst = arith.constant dense<0xFF800000> : vector<2x256xf32>
    %1 = vector.multi_reduction <maximumf>, %0, %cst [1] : vector<2x4x256xf32> to vector<2x256xf32>
    %2 = vector.shape_cast %1 : vector<2x256xf32> to vector<2x1x256xf32>
    %3 = vector.broadcast %2 : vector<2x1x256xf32> to vector<2x4x256xf32>
    %4 = arith.subf %0, %3 : vector<2x4x256xf32>
    %5 = math.exp %4 : vector<2x4x256xf32>
    %cst_2 = arith.constant dense<0.000000e+00> : vector<2x256xf32>
    %6 = vector.multi_reduction <add>, %5, %cst_2 [1] : vector<2x4x256xf32> to vector<2x256xf32>
    %7 = vector.shape_cast %6 : vector<2x256xf32> to vector<2x1x256xf32>
    %8 = tpu.reciprocal %7 : vector<2x1x256xf32> -> vector<2x1x256xf32>
    %9 = vector.broadcast %8 : vector<2x1x256xf32> to vector<2x4x256xf32>
    %10 = arith.mulf %5, %9 : vector<2x4x256xf32>
    %c0_3 = arith.constant 0 : index
    %c0_4 = arith.constant 0 : index
    %c0_5 = arith.constant 0 : index
    %11 = vector.load %arg3[%c0_3, %c0_4, %c0_5] : memref<2x4x256xf32, #tpu.memory_space<vmem>>, vector<2x4x256xf32>
    tpu.vector_store %arg3[%c0_3, %c0_4, %c0_5], %10 {strides = array<i32>} : memref<2x4x256xf32, #tpu.memory_space<vmem>>, vector<2x4x256xf32>,
    return
  }
  func.func @transform_0(%arg0: i32, %arg1: i32) -> (i32, i32, i32) {
    %c0_i32 = arith.constant 0 : i32
    %c0_i32_0 = arith.constant 0 : i32
    return %arg0, %c0_i32, %arg1 : i32, i32, i32
  }
  func.func @transform_1(%arg0: i32, %arg1: i32) -> (i32, i32, i32) {
    %c0_i32 = arith.constant 0 : i32
    %c0_i32_0 = arith.constant 0 : i32
    return %arg0, %c0_i32, %arg1 : i32, i32, i32
  }
}

</mosaic_0001>

<bundles_post_ra>
// kernel: pallas_softmax.1
= control target key start
LH: loop header
LB: loop body
LE: loop exit
PB: predicated region body
PF: predicated region fallthrough
CT: control target
= control target key end

     0   :  { %vm16_vm0 = vcmask 1043456   ;;  %s157_s0 = inlined_call_operand.vmem [shape: f32[2,4,256], index: 0, kind: input, shape index: {}]   ;;  %s158_s1 = inlined_call_operand.vmem [shape: f32[2,4,256], index: 1, kind: output, shape index: {}]  }
   0x1   :  { %v8_v0 = vld [vmem:[%s157_s0] sm:$0xff]  ;;  %v9_v1 = vld [vmem:[%s157_s0 + $0x8] sm:$0xff] }
   0x2   :  { %v12_v2 = vcombine.high %v8_v0, %v8_v0  ;;  %v17_v3 = vsel %vm16_vm0, %v8_v0, -inf  ;;  %v13_v4 = vcombine.high %v9_v1, %v9_v1  ;;  %v31_v5 = vsel %vm16_vm0, %v9_v1, -inf }
   0x3   :  { %v18_v6 = vrot.slane %v17_v3, 4  ;;  %v32_v7 = vrot.slane %v31_v5, 4 }
   0x4   :  { %v24_v8 = vsel %vm16_vm0, %v12_v2, -inf  ;;  %v38_v9 = vsel %vm16_vm0, %v13_v4, -inf }
   0x5   :  { %v19_v10 = vmax.f32 %v17_v3, %v18_v6  ;;  %v25_v11 = vrot.slane %v24_v8, 4  ;;  %v33_v12 = vmax.f32 %v31_v5, %v32_v7  ;;  %v39_v13 = vrot.slane %v38_v9, 4 }
   0x7   :  { %v20_v14 = vrot.slane %v19_v10, 2  ;;  %v26_v15 = vmax.f32 %v24_v8, %v25_v11  ;;  %v34_v16 = vrot.slane %v33_v12, 2  ;;  %v40_v17 = vmax.f32 %v38_v9, %v39_v13 }
   0x9   :  { %v21_v18 = vmax.f32 %v19_v10, %v20_v14  ;;  %v27_v19 = vrot.slane %v26_v15, 2  ;;  %v35_v20 = vmax.f32 %v33_v12, %v34_v16  ;;  %v41_v21 = vrot.slane %v40_v17, 2 }
   0xb   :  { %v22_v22 = vrot.slane %v21_v18, 1  ;;  %v28_v23 = vmax.f32 %v26_v15, %v27_v19  ;;  %v36_v24 = vrot.slane %v35_v20, 1  ;;  %v42_v25 = vmax.f32 %v40_v17, %v41_v21 }
   0xd   :  { %v23_v26 = vmax.f32 %v21_v18, %v22_v22  ;;  %v29_v27 = vrot.slane %v28_v23, 1  ;;  %v37_v28 = vmax.f32 %v35_v20, %v36_v24  ;;  %v43_v29 = vrot.slane %v42_v25, 1 }
   0xf   :  { %v30_v30 = vmax.f32 %v28_v23, %v29_v27  ;;  %v44_v31 = vmax.f32 %v42_v25, %v43_v29 }
  0x11   :  { %v49_v32 = vcombine.low %v23_v26, %v30_v30  ;;  %v50_v33 = vcombine.low %v37_v28, %v44_v31 }
  0x13   :  { %v53_v34 = vsub.f32 %v8_v0, %v49_v32  ;;  %v54_v35 = vsub.f32 %v9_v1, %v50_v33 }
  0x15   :  { %v55_v36 = vmul.f32 1.442695, %v53_v34  ;;  %v57_v37 = vmul.f32 1.442695, %v54_v35 }
  0x17   :  { %115 = vpow2.f32 %v55_v36 }
  0x18   :  { %117 = vpow2.f32 %v57_v37 }
  0x24   :  { %v116_v38 = vpop.eup %115 }
  0x25   :  { %v118_v39 = vpop.eup %117  ;;  %v61_v40 = vcombine.high %v116_v38, %v116_v38  ;;  %v65_v41 = vsel %vm16_vm0, %v116_v38, 0.0 }
  0x26   :  { %v66_v42 = vrot.slane %v65_v41, 4  ;;  %v62_v43 = vcombine.high %v118_v39, %v118_v39  ;;  %v79_v44 = vsel %vm16_vm0, %v118_v39, 0.0 }
  0x27   :  { %v72_v45 = vsel %vm16_vm0, %v61_v40, 0.0  ;;  %v80_v46 = vrot.slane %v79_v44, 4 }
  0x28   :  { %v67_v47 = vadd.f32 %v66_v42, %v65_v41  ;;  %v73_v48 = vrot.slane %v72_v45, 4  ;;  %v86_v49 = vsel %vm16_vm0, %v62_v43, 0.0 }
  0x29   :  { %v81_v50 = vadd.f32 %v80_v46, %v79_v44  ;;  %v87_v51 = vrot.slane %v86_v49, 4 }
  0x2a   :  { %v68_v52 = vrot.slane %v67_v47, 2  ;;  %v74_v53 = vadd.f32 %v73_v48, %v72_v45 }
  0x2b   :  { %v82_v54 = vrot.slane %v81_v50, 2  ;;  %v88_v55 = vadd.f32 %v87_v51, %v86_v49 }
  0x2c   :  { %v69_v56 = vadd.f32 %v68_v52, %v67_v47  ;;  %v75_v57 = vrot.slane %v74_v53, 2 }
  0x2d   :  { %v83_v58 = vadd.f32 %v82_v54, %v81_v50  ;;  %v89_v59 = vrot.slane %v88_v55, 2 }
  0x2e   :  { %v70_v60 = vrot.slane %v69_v56, 1  ;;  %v76_v61 = vadd.f32 %v75_v57, %v74_v53 }
  0x2f   :  { %v84_v62 = vrot.slane %v83_v58, 1  ;;  %v90_v63 = vadd.f32 %v89_v59, %v88_v55 }
  0x30   :  { %v71_v0 = vadd.f32 %v70_v60, %v69_v56  ;;  %v77_v1 = vrot.slane %v76_v61, 1 }
  0x31   :  { %v85_v2 = vadd.f32 %v84_v62, %v83_v58  ;;  %v91_v3 = vrot.slane %v90_v63, 1 }
  0x32   :  { %v78_v4 = vadd.f32 %v77_v1, %v76_v61  ;;  %119 = vrcp.f32 %v71_v0 }
  0x33   :  { %v92_v5 = vadd.f32 %v91_v3, %v90_v63  ;;  %121 = vrcp.f32 %v85_v2 }
  0x34   :  { %123 = vrcp.f32 %v78_v4 }
  0x35   :  { %125 = vrcp.f32 %v92_v5 }
  0x3f   :  { %v120_v6 = vpop.eup %119 }
  0x40   :  { %v122_v7 = vpop.eup %121 }
  0x41   :  { %v124_v8 = vpop.eup %123 }
  0x42   :  { %v126_v9 = vpop.eup %125  ;;  %v101_v10 = vcombine.low %v120_v6, %v124_v8 }
  0x43   :  { %v102_v11 = vcombine.low %v122_v7, %v126_v9 }
  0x44   :  { %v105_v12 = vmul.f32 %v116_v38, %v101_v10 }
  0x45   :  { %v106_v13 = vmul.f32 %v118_v39, %v102_v11 }
  0x46   :  { %107 = vst [vmem:[%s158_s1] sm:$0xff] %v105_v12 }
  0x47   :  { %108 = vst [vmem:[%s158_s1 + $0x8] sm:$0xff] %v106_v13 }

</bundles_post_ra>
